<compile_context>
chip_gen: v7x
topology: tpu7x:2x2x1
jax: 0.10.0
libtpu: 0.0.40
codegen_flags: <defaults>
</compile_context>

<pallas_src>
import jax
import jax.numpy as jnp
from jax.experimental import pallas as pl
from jax.experimental.pallas import tpu as pltpu

NUM_EMBEDDINGS = 1000
GEN_DIM = 8            # generation embedding dim
PT_DIM = 16            # parent / trait projection dim
IN_BITS = 64           # parent_bits / trait_bits width
HIDDEN = 64            # fc_out hidden width
EMB_DIM = 32           # output embedding dim
COMBINED = GEN_DIM + PT_DIM + PT_DIM   # 40
PT_IN = 2 * IN_BITS    # 128 (fused parent|trait input width)
PT_OUT = 2 * PT_DIM    # 32  (fused parent|trait output width)


def genome_encoder_kernel(gen_emb_ref, pt_bits_ref,
                          wpt_ref, bpt_ref,
                          w1_ref, b1_ref,
                          w2_ref, b2_ref,
                          out_ref):
    # --- parent_fc + trait_fc fused: (TILE_B,128)bf16 @ (128,32)bf16 -> f32 ---
    pt = jnp.dot(pt_bits_ref[...], wpt_ref[...],
                 preferred_element_type=jnp.float32)          # (TILE_B, 32)
    pt = jnp.maximum(pt + bpt_ref[...], 0.0)                  # bias+ReLU in f32

    # --- fc_out layer 1: lane-concat [gen_emb | parent_emb | trait_emb] ---
    combined = jnp.concatenate(
        [gen_emb_ref[...], pt.astype(jnp.bfloat16)], axis=-1)  # (TILE_B, 40) bf16
    h = jnp.dot(combined, w1_ref[...],
                preferred_element_type=jnp.float32)            # (TILE_B, 64)
    h = jnp.maximum(h + b1_ref[...], 0.0)

    # --- fc_out layer 2 ---
    out_ref[...] = (jnp.dot(h.astype(jnp.bfloat16), w2_ref[...],
                            preferred_element_type=jnp.float32)
                    + b2_ref[...])                             # (TILE_B, 32) f32


def genome_encoder(generation, parent_bits, trait_bits, params, *, tile_b=512):
    """generation: (B,) int32; parent_bits/trait_bits: (B, 64) -> (B, 32) f32."""
    B = generation.shape[0]
    # Tile size: multiple of 8 sublanes, capped at the (padded) batch size.
    tile_b = max(8, min(((tile_b + 7) // 8) * 8, ((B + 7) // 8) * 8))
    b_pad = pl.cdiv(B, tile_b) * tile_b
    pad = b_pad - B

    gen = generation.astype(jnp.int32)
    pbits = parent_bits.astype(jnp.float32)
    tbits = trait_bits.astype(jnp.float32)
    if pad:
        gen = jnp.pad(gen, (0, pad))                    # pad with a valid index
        pbits = jnp.pad(pbits, ((0, pad), (0, 0)))
        tbits = jnp.pad(tbits, ((0, pad), (0, 0)))

    # Embedding lookup in the wrapper (ids assumed in [0, 1000), matching
    # nn.Embedding); result is a dense (B_pad, 8) operand for the kernel.
    gen_emb = jnp.take(params["table"], gen, axis=0).astype(jnp.bfloat16)
    # Fused parent|trait bit input (exact 0/1 values -> bf16 lossless).
    pt_bits = jnp.concatenate([pbits, tbits], axis=1).astype(jnp.bfloat16)

    grid = (b_pad // tile_b,)
    out = pl.pallas_call(
        genome_encoder_kernel,
        grid=grid,
        in_specs=[
            pl.BlockSpec((tile_b, GEN_DIM), lambda i: (i, 0)),
            pl.BlockSpec((tile_b, PT_IN), lambda i: (i, 0)),
            # Weights/biases: constant block index -> stay VMEM-resident.
            pl.BlockSpec((PT_IN, PT_OUT), lambda i: (0, 0)),
            pl.BlockSpec((1, PT_OUT), lambda i: (0, 0)),
            pl.BlockSpec((COMBINED, HIDDEN), lambda i: (0, 0)),
            pl.BlockSpec((1, HIDDEN), lambda i: (0, 0)),
            pl.BlockSpec((HIDDEN, EMB_DIM), lambda i: (0, 0)),
            pl.BlockSpec((1, EMB_DIM), lambda i: (0, 0)),
        ],
        out_specs=pl.BlockSpec((tile_b, EMB_DIM), lambda i: (i, 0)),
        out_shape=jax.ShapeDtypeStruct((b_pad, EMB_DIM), jnp.float32),
        compiler_params=pltpu.CompilerParams(
            dimension_semantics=("parallel",)),
    )(gen_emb, pt_bits,
      params["wpt"], params["bpt"],
      params["w1"], params["b1"],
      params["w2"], params["b2"])

    return out[:B]


def init_params(key):
    """Deterministic synthetic parameters matching the nn.Module shapes."""
    ks = jax.random.split(key, 8)

    def uniform(k, shape, fan_in):
        bound = 1.0 / jnp.sqrt(jnp.float32(fan_in))
        return jax.random.uniform(k, shape, jnp.float32, -bound, bound)

    table = jax.random.normal(ks[0], (NUM_EMBEDDINGS, GEN_DIM), jnp.float32)

    # nn.Linear(64, 16) x2 — stored transposed (in, out); weights quantized bf16.
    pw = uniform(ks[1], (IN_BITS, PT_DIM), IN_BITS).astype(jnp.bfloat16)
    pb = uniform(ks[2], (1, PT_DIM), IN_BITS)
    tw = uniform(ks[3], (IN_BITS, PT_DIM), IN_BITS).astype(jnp.bfloat16)
    tb = uniform(ks[4], (1, PT_DIM), IN_BITS)

    # nn.Linear(40, 64) and nn.Linear(64, 32).
    w1 = uniform(ks[5], (COMBINED, HIDDEN), COMBINED).astype(jnp.bfloat16)
    b1 = uniform(ks[6], (1, HIDDEN), COMBINED)
    w2 = uniform(ks[7], (HIDDEN, EMB_DIM), HIDDEN).astype(jnp.bfloat16)
    b2 = jnp.zeros((1, EMB_DIM), jnp.float32)

    # Block-diagonal fusion of parent_fc | trait_fc for one 128-wide matmul.
    wpt = jnp.zeros((PT_IN, PT_OUT), jnp.bfloat16)
    wpt = wpt.at[:IN_BITS, :PT_DIM].set(pw)
    wpt = wpt.at[IN_BITS:, PT_DIM:].set(tw)
    bpt = jnp.concatenate([pb, tb], axis=1)

    return {"table": table,
            "pw": pw, "pb": pb, "tw": tw, "tb": tb,
            "wpt": wpt, "bpt": bpt,
            "w1": w1, "b1": b1, "w2": w2, "b2": b2}


def reference(generation, parent_bits, trait_bits, params):
    """Pure-JAX reference with the UNFUSED module structure (same dtypes)."""
    gen_emb = jnp.take(params["table"], generation, axis=0).astype(jnp.bfloat16)
    parent_emb = jax.nn.relu(
        jnp.dot(parent_bits.astype(jnp.bfloat16), params["pw"],
                preferred_element_type=jnp.float32) + params["pb"])
    trait_emb = jax.nn.relu(
        jnp.dot(trait_bits.astype(jnp.bfloat16), params["tw"],
                preferred_element_type=jnp.float32) + params["tb"])
    combined = jnp.concatenate(
        [gen_emb, parent_emb.astype(jnp.bfloat16),
         trait_emb.astype(jnp.bfloat16)], axis=1)
    h = jax.nn.relu(jnp.dot(combined, params["w1"],
                            preferred_element_type=jnp.float32) + params["b1"])
    return jnp.dot(h.astype(jnp.bfloat16), params["w2"],
                   preferred_element_type=jnp.float32) + params["b2"]


if __name__ == "__main__":
    key = jax.random.PRNGKey(0)
    k_param, k_gen, k_parent, k_trait = jax.random.split(key, 4)

    B = 8
    params = init_params(k_param)
    generation = jax.random.randint(k_gen, (B,), 0, NUM_EMBEDDINGS, jnp.int32)
    parent_bits = jax.random.bernoulli(k_parent, 0.5, (B, IN_BITS)).astype(jnp.float32)
    trait_bits = jax.random.bernoulli(k_trait, 0.5, (B, IN_BITS)).astype(jnp.float32)

    out = genome_encoder(generation, parent_bits, trait_bits, params)
    out = jax.block_until_ready(out)

    ref = reference(generation, parent_bits, trait_bits, params)
    assert out.shape == (B, EMB_DIM)
    assert jnp.allclose(out, ref, atol=1e-3, rtol=1e-3), (
        f"max abs diff {jnp.max(jnp.abs(out - ref))}")

    print("KERNEL_OK")
</pallas_src>

<mosaic_0001>
module attributes {stable_mosaic.version = 11 : i64} {
  func.func @genome_encoder_kernel(%arg0: i32, %arg1: memref<8x8xbf16, #tpu.memory_space<vmem>>, %arg2: memref<8x128xbf16, #tpu.memory_space<vmem>>, %arg3: memref<128x32xbf16, #tpu.memory_space<vmem>>, %arg4: memref<1x32xf32, #tpu.memory_space<vmem>>, %arg5: memref<40x64xbf16, #tpu.memory_space<vmem>>, %arg6: memref<1x64xf32, #tpu.memory_space<vmem>>, %arg7: memref<64x32xbf16, #tpu.memory_space<vmem>>, %arg8: memref<1x32xf32, #tpu.memory_space<vmem>>, %arg9: memref<8x32xf32, #tpu.memory_space<vmem>>) attributes {dimension_semantics = [#tpu.dimension_semantics<parallel>], iteration_bounds = array<i64: 1>, scalar_prefetch = 0 : i64, scratch_operands = 0 : i64, tpu.core_type = #tpu.core_type<tc>, window_params = [{transform_indices = @transform_0, window_bounds = array<i64: 8, 8>}, {transform_indices = @transform_1, window_bounds = array<i64: 8, 128>}, {pipeline_mode = #tpu.pipeline_mode<synchronous>, transform_indices = @transform_2, window_bounds = array<i64: 128, 32>}, {pipeline_mode = #tpu.pipeline_mode<synchronous>, transform_indices = @transform_3, window_bounds = array<i64: 1, 32>}, {pipeline_mode = #tpu.pipeline_mode<synchronous>, transform_indices = @transform_4, window_bounds = array<i64: 40, 64>}, {pipeline_mode = #tpu.pipeline_mode<synchronous>, transform_indices = @transform_5, window_bounds = array<i64: 1, 64>}, {pipeline_mode = #tpu.pipeline_mode<synchronous>, transform_indices = @transform_6, window_bounds = array<i64: 64, 32>}, {pipeline_mode = #tpu.pipeline_mode<synchronous>, transform_indices = @transform_7, window_bounds = array<i64: 1, 32>}, {transform_indices = @transform_8, window_bounds = array<i64: 8, 32>}]} {
    %c0 = arith.constant 0 : index
    %c0_0 = arith.constant 0 : index
    %0 = vector.load %arg2[%c0, %c0_0] : memref<8x128xbf16, #tpu.memory_space<vmem>>, vector<8x128xbf16>
    %c0_1 = arith.constant 0 : index
    %c0_2 = arith.constant 0 : index
    %1 = vector.load %arg3[%c0_1, %c0_2] : memref<128x32xbf16, #tpu.memory_space<vmem>>, vector<128x32xbf16>
    %cst = arith.constant dense<0.000000e+00> : vector<8x32xf32>
    %2 = tpu.matmul %0, %1, %cst {dimension_numbers = #tpu.dot_dimension_numbers<[1], [0], [0], [1], [0, 0, 1, 1], [], []>} : vector<8x128xbf16>, vector<128x32xbf16>, vector<8x32xf32> -> vector<8x32xf32>
    %c0_3 = arith.constant 0 : index
    %c0_4 = arith.constant 0 : index
    %3 = vector.load %arg4[%c0_3, %c0_4] : memref<1x32xf32, #tpu.memory_space<vmem>>, vector<1x32xf32>
    %4 = vector.broadcast %3 : vector<1x32xf32> to vector<8x32xf32>
    %5 = arith.addf %2, %4 : vector<8x32xf32>
    %cst_5 = arith.constant 0.000000e+00 : f32
    %6 = vector.broadcast %cst_5 : f32 to vector<8x32xf32>
    %7 = arith.maximumf %5, %6 : vector<8x32xf32>
    %c0_6 = arith.constant 0 : index
    %c0_7 = arith.constant 0 : index
    %8 = vector.load %arg1[%c0_6, %c0_7] : memref<8x8xbf16, #tpu.memory_space<vmem>>, vector<8x8xbf16>
    %9 = arith.truncf %7 : vector<8x32xf32> to vector<8x32xbf16>
    %10 = tpu.concatenate %8, %9 in 1 : vector<8x8xbf16>, vector<8x32xbf16> -> vector<8x40xbf16>
    %c0_8 = arith.constant 0 : index
    %c0_9 = arith.constant 0 : index
    %11 = vector.load %arg5[%c0_8, %c0_9] : memref<40x64xbf16, #tpu.memory_space<vmem>>, vector<40x64xbf16>
    %cst_10 = arith.constant dense<0.000000e+00> : vector<8x64xf32>
    %12 = tpu.matmul %10, %11, %cst_10 {dimension_numbers = #tpu.dot_dimension_numbers<[1], [0], [0], [1], [0, 0, 1, 1], [], []>} : vector<8x40xbf16>, vector<40x64xbf16>, vector<8x64xf32> -> vector<8x64xf32>
    %c0_11 = arith.constant 0 : index
    %c0_12 = arith.constant 0 : index
    %13 = vector.load %arg6[%c0_11, %c0_12] : memref<1x64xf32, #tpu.memory_space<vmem>>, vector<1x64xf32>
    %14 = vector.broadcast %13 : vector<1x64xf32> to vector<8x64xf32>
    %15 = arith.addf %12, %14 : vector<8x64xf32>
    %cst_13 = arith.constant 0.000000e+00 : f32
    %16 = vector.broadcast %cst_13 : f32 to vector<8x64xf32>
    %17 = arith.maximumf %15, %16 : vector<8x64xf32>
    %18 = arith.truncf %17 : vector<8x64xf32> to vector<8x64xbf16>
    %c0_14 = arith.constant 0 : index
    %c0_15 = arith.constant 0 : index
    %19 = vector.load %arg7[%c0_14, %c0_15] : memref<64x32xbf16, #tpu.memory_space<vmem>>, vector<64x32xbf16>
    %cst_16 = arith.constant dense<0.000000e+00> : vector<8x32xf32>
    %20 = tpu.matmul %18, %19, %cst_16 {dimension_numbers = #tpu.dot_dimension_numbers<[1], [0], [0], [1], [0, 0, 1, 1], [], []>} : vector<8x64xbf16>, vector<64x32xbf16>, vector<8x32xf32> -> vector<8x32xf32>
    %c0_17 = arith.constant 0 : index
    %c0_18 = arith.constant 0 : index
    %21 = vector.load %arg8[%c0_17, %c0_18] : memref<1x32xf32, #tpu.memory_space<vmem>>, vector<1x32xf32>
    %22 = vector.broadcast %21 : vector<1x32xf32> to vector<8x32xf32>
    %23 = arith.addf %20, %22 : vector<8x32xf32>
    %c0_19 = arith.constant 0 : index
    %c0_20 = arith.constant 0 : index
    %24 = vector.load %arg9[%c0_19, %c0_20] : memref<8x32xf32, #tpu.memory_space<vmem>>, vector<8x32xf32>
    tpu.vector_store %arg9[%c0_19, %c0_20], %23 {strides = array<i32>} : memref<8x32xf32, #tpu.memory_space<vmem>>, vector<8x32xf32>,
    return
  }
  func.func @transform_0(%arg0: i32) -> (i32, i32) {
    %c0_i32 = arith.constant 0 : i32
    %c0_i32_0 = arith.constant 0 : i32
    return %arg0, %c0_i32 : i32, i32
  }
  func.func @transform_1(%arg0: i32) -> (i32, i32) {
    %c0_i32 = arith.constant 0 : i32
    %c0_i32_0 = arith.constant 0 : i32
    return %arg0, %c0_i32 : i32, i32
  }
  func.func @transform_2(%arg0: i32) -> (i32, i32) {
    %c0_i32 = arith.constant 0 : i32
    %c0_i32_0 = arith.constant 0 : i32
    %c0_i32_1 = arith.constant 0 : i32
    return %c0_i32, %c0_i32_0 : i32, i32
  }
  func.func @transform_3(%arg0: i32) -> (i32, i32) {
    %c0_i32 = arith.constant 0 : i32
    %c0_i32_0 = arith.constant 0 : i32
    %c0_i32_1 = arith.constant 0 : i32
    return %c0_i32, %c0_i32_0 : i32, i32
  }
  func.func @transform_4(%arg0: i32) -> (i32, i32) {
    %c0_i32 = arith.constant 0 : i32
    %c0_i32_0 = arith.constant 0 : i32
    %c0_i32_1 = arith.constant 0 : i32
    return %c0_i32, %c0_i32_0 : i32, i32
  }
  func.func @transform_5(%arg0: i32) -> (i32, i32) {
    %c0_i32 = arith.constant 0 : i32
    %c0_i32_0 = arith.constant 0 : i32
    %c0_i32_1 = arith.constant 0 : i32
    return %c0_i32, %c0_i32_0 : i32, i32
  }
  func.func @transform_6(%arg0: i32) -> (i32, i32) {
    %c0_i32 = arith.constant 0 : i32
    %c0_i32_0 = arith.constant 0 : i32
    %c0_i32_1 = arith.constant 0 : i32
    return %c0_i32, %c0_i32_0 : i32, i32
  }
  func.func @transform_7(%arg0: i32) -> (i32, i32) {
    %c0_i32 = arith.constant 0 : i32
    %c0_i32_0 = arith.constant 0 : i32
    %c0_i32_1 = arith.constant 0 : i32
    return %c0_i32, %c0_i32_0 : i32, i32
  }
  func.func @transform_8(%arg0: i32) -> (i32, i32) {
    %c0_i32 = arith.constant 0 : i32
    %c0_i32_0 = arith.constant 0 : i32
    return %arg0, %c0_i32 : i32, i32
  }
}

</mosaic_0001>

<bundles_post_ra>
// kernel: tpu_custom_call.1
= control target key start
LH: loop header
LB: loop body
LE: loop exit
PB: predicated region body
PF: predicated region fallthrough
CT: control target
= control target key end

     0   :  { %v451_v1 = vmov 0.0   ;;  %vm452_vm0 = vmmov 0   ;;  %s593_s0 = inlined_call_operand.vmem [shape: bf16[8,8], index: 0, kind: input, shape index: {}]   ;;  %s594_s1 = inlined_call_operand.vmem [shape: bf16[8,128], index: 1, kind: input, shape index: {}]   ;;  %s595_s2 = inlined_call_operand.vmem [shape: bf16[128,32], index: 2, kind: input, shape index: {}]   ;;  %s596_s3 = inlined_call_operand.vmem [shape: f32[1,32], index: 3, kind: input, shape index: {}]   ;;  %s597_s4 = inlined_call_operand.vmem [shape: bf16[40,64], index: 4, kind: input, shape index: {}]   ;;  %s598_s5 = inlined_call_operand.vmem [shape: f32[1,64], index: 5, kind: input, shape index: {}]   ;;  %s599_s6 = inlined_call_operand.vmem [shape: bf16[64,32], index: 6, kind: input, shape index: {}]   ;;  %s600_s7 = inlined_call_operand.vmem [shape: f32[1,32], index: 7, kind: input, shape index: {}]   ;;  %s601_s8 = inlined_call_operand.hbm [shape: f32[8,32], index: 8, kind: output, shape index: {}]  }
   0x1   :  { %v412_v0 = vld [vmem:[%s595_s2] sm:$0xff]   ;;  %366 = vmatprep.subr.bf16.mxu0 %v451_v1  ;;  %386 = vmatprep.subr.bf16.mxu1 %v451_v1  ;;  %v413_v2 = vld [vmem:[%s595_s2 + $0x8] sm:$0xff]   ;;  %v414_v3 = vld [vmem:[%s595_s2 + $0x10] sm:$0xff]  }
   0x2   :  { %367 = vmatpush3.bf16.msra.mxu0 %v412_v0  ;;  %382 = vmatprep.mubr.msk.bf16.mxu0 %vm452_vm0, %v451_v1  ;;  %v415_v4 = vld [vmem:[%s595_s2 + $0x18] sm:$0xff]  }
   0x3   :  { %368 = vmatprep.subr.bf16.mxu0 %v451_v1  ;;  %392 = vmatprep.mubr.msk.bf16.mxu1 %vm452_vm0, %v451_v1 }
   0x6   :  { %369 = vmatpush3.bf16.msra.mxu0 %v413_v2 }
   0x7   :  { %370 = vmatprep.subr.bf16.mxu0 %v451_v1 }
   0xa   :  { %371 = vmatpush3.bf16.msra.mxu0 %v414_v3 }
   0xb   :  { %372 = vmatprep.subr.bf16.mxu0 %v451_v1 }
   0xc   :  { %13 = vsyncpa [#allocation3], 0  ;;  %v416_v5 = vld [vmem:[%s595_s2 + $0x20] sm:$0xff]   ;;  %v417_v6 = vld [vmem:[%s595_s2 + $0x28] sm:$0xff]   ;;  %vm183_vm1 = vcmask 1043456   ;;  %vm149_vm2 = vcmask 64512  }
   0xd   :  { %v418_v7 = vld [vmem:[%s595_s2 + $0x30] sm:$0xff]   ;;  %v419_v8 = vld [vmem:[%s595_s2 + $0x38] sm:$0xff]   ;;  %v31_v9 = vld [vmem:[%s594_s1] sm:$0xf]  ;;  %vm180_vm3 = vcmask 326656   ;;  %vm268_vm4 = vcmask 523264  }
   0xe   :  { %373 = vmatpush3.bf16.msra.mxu0 %v415_v4  ;;  %v420_v10 = vld [vmem:[%s597_s4] sm:$0xff]   ;;  %v421_v11 = vld [vmem:[%s597_s4 + $0x8] sm:$0xff]   ;;  %v422_v12 = vld [vmem:[%s597_s4 + $0x10] ss:$0 sps:$4 sm:$0xff]   ;;  %s453_s4 = smov 8   ;;  %s454_s19 = smov [#allocation2]  }
   0xf   :  { %374 = vmatprep.subr.bf16.mxu0 %v451_v1  ;;  %387 = vmatpush3.bf16.msra.mxu1 %v420_v10  ;;  %v185_v13 = vsel %vm183_vm1, %v422_v12, 0  ;;  %v328_v14 = vld [vmem:[%s596_s3] ss:$0 sm:$0xff]  ;;  %v424_v26 = vld [vmem:[%s599_s6 + $0x8] sm:$0xff]   ;;  %v425_v27 = vld [vmem:[%s599_s6 + $0x10] sm:$0xff]   ;;  %vm312_vm5 = vcmask 261120  }
  0x10   :  { %388 = vmatprep.subr.bf16.mxu1 %v451_v1  ;;  %v144_v22 = vld [vmem:[%s593_s0] sm:$0xf]  ;;  %v426_v28 = vld [vmem:[%s599_s6 + $0x18] sm:$0xff]  }
  0x11   :  { %v423_v23 = vld [vmem:[%s599_s6] sm:$0xff]   ;;  %s320_s6 = sshll.u32 %s454_s19, 4  ;;  %s321_s6 = int_to_ptr.vmem [resolvable:$true] %s320_s6 }
  0x12   :  { %375 = vmatpush3.bf16.msra.mxu0 %v416_v5  ;;  %v337_v29 = vld [vmem:[%s598_s5] ss:$0 sm:$0xff]  ;;  %s427_s5 = scalar_lea.vmem %s321_s6, 128  ;;  %p432_p1 = scmp.lt.s32.totalorder %s321_s6, %s321_s6 }
  0x13   :  { %376 = vmatprep.subr.bf16.mxu0 %v451_v1  ;;  %389 = vmatpush3.bf16.msra.mxu1 %v421_v11  ;;  %v342_v37 = vld [vmem:[%s600_s7] ss:$0 sm:$0xff]  ;;  %p428_p0 = scmp.ne.s32.totalorder %s321_s6, %s427_s5  ;;  %p433_p2 = scmp.lt.s32.totalorder %s427_s5, %s427_s5 }
  0x14   :  { %390 = vmatprep.subr.bf16.mxu1 %v451_v1 }
  0x15   :  { %p434_p3 = por %p433_p2, %p432_p1 }
  0x16   :  { %377 = vmatpush3.bf16.msra.mxu0 %v417_v6 }
  0x17   :  { %378 = vmatprep.subr.bf16.mxu0 %v451_v1  ;;  %391 = vmatpush3.bf16.msra.mxu1 %v185_v13  ;;  %p435_p4 = pnand %p434_p3, %p428_p0 }
  0x18   :  { %396 = vmatprep.subr.bf16.mxu1 %v451_v1 }
  0x1a   :  { %379 = vmatpush3.bf16.msra.mxu0 %v418_v7 }
  0x1b   :  { %380 = vmatprep.subr.bf16.mxu0 %v451_v1 }
  0x1e   :  { %381 = vmatpush3.bf16.msra.mxu0 %v419_v8 }
  0x21   :  { %383 = vmatmul.mubr.bf16.vlgmr.msra.gmra.mrb[0].mxu0 %v31_v9 }
  0xf4   :  { %v137_v15 = vpop.f32.mrb[0].mxu0 }
  0xf5   :  { %v138_v16 = vadd.f32 %v328_v14, %v137_v15  ;;  %v384_v17 = vpop.f32.mrb[1].mxu0 }
  0xf6   :  { %v140_v18 = vpop.f32.mrb[2].mxu0 }
  0xf7   :  { %v143_v19 = vmax.f32 %v138_v16, 0.0  ;;  %v385_v20 = vpop.f32.mrb[3].mxu0 }
  0xf9   :  { %v145_v21 = vpack.c.bf16 %v143_v19, %v143_v19 }
  0xfb   :  { %147 = vrot.lane.b32.xlu0 %v145_v21, %s453_s4 }
 0x16d   :  { %v148_v24 = vpop.permute.xlu0 %147 }
 0x16e   :  { %v152_v25 = vsel %vm149_vm2, %v144_v22, %v148_v24 }
 0x16f   :  { %393 = vmatmul.mubr.msk.bf16.vlgmr.msra.gmra.mrb[0].mxu1 %vm180_vm3, %v152_v25 }
 0x170   :  { %397 = vmatpush3.bf16.msra.mxu1 %v423_v23  ;;  %404 = vmatprep.mubr.msk.bf16.mxu1 %vm452_vm0, %v451_v1 }
 0x171   :  { %398 = vmatprep.subr.bf16.mxu1 %v451_v1 }
 0x174   :  { %399 = vmatpush3.bf16.msra.mxu1 %v424_v26 }
 0x175   :  { %400 = vmatprep.subr.bf16.mxu1 %v451_v1 }
 0x178   :  { %401 = vmatpush3.bf16.msra.mxu1 %v425_v27 }
 0x179   :  { %402 = vmatprep.subr.bf16.mxu1 %v451_v1 }
 0x17c   :  { %403 = vmatpush3.bf16.msra.mxu1 %v426_v28 }
 0x242   :  { %v221_v30 = vpop.f32.mrb[0].mxu1 }
 0x243   :  { %v222_v31 = vadd.f32 %v337_v29, %v221_v30  ;;  %v394_v32 = vpop.f32.mrb[1].mxu1 }
 0x244   :  { %v224_v33 = vpop.f32.mrb[2].mxu1 }
 0x245   :  { %v227_v34 = vmax.f32 %v222_v31, 0.0  ;;  %v395_v35 = vpop.f32.mrb[3].mxu1 }
 0x247   :  { %v228_v36 = vpack.c.bf16 %v227_v34, %v227_v34 }
 0x249   :  { %405 = vmatmul.mubr.msk.bf16.vlgmr.msra.gmra.mrb[4].mxu1 %vm268_vm4, %v228_v36 }
 0x31c   :  { %v306_v38 = vpop.f32.mrb[4].mxu1 }
 0x31d   :  { %v307_v39 = vadd.f32 %v342_v37, %v306_v38  ;;  %v406_v40 = vpop.f32.mrb[5].mxu1 }
 0x31e   :  { %v309_v41 = vpop.f32.mrb[6].mxu1 }
 0x31f   :  { %v407_v42 = vpop.f32.mrb[7].mxu1  ;;  %313 = vst.msk [vmem:[#allocation2] sm:$0xff] %vm312_vm5, %v307_v39 }
 0x320   :  { %438 = shalt.err (!%p435_p4)
}
 0x321   :  { %s439_s7 = scalar_lea.hbm %s601_s8, 128 }
 0x322   :  { %p440_p5 = scmp.ne.s32.totalorder %s601_s8, %s439_s7  ;;  %p443_p6 = scmp.lt.u32.totalorder %s439_s7, %s601_s8 }
 0x324   :  { %p445_p7 = pnand %p443_p6, %p440_p5 }
 0x326   :  { %448 = shalt.err (!%p445_p7)
}
 0x327   :  { %323 = dma.vmem_to_hbm [thread:$0]  %s321_s6, 128, %s601_s8, [#allocation3]  }
 0x328   :  { %449 = dma.done.wait [#allocation3], 128  }
 0x329   :  { %450 = vsyncadd [#allocation3], 4294967168 }
 0x32a   :  { %327 = vsyncpa [#allocation3], 1 }

</bundles_post_ra>
